<compile_context>
chip_gen: v5e
topology: v5e:2x2
jax: 0.10.0
libtpu: 0.0.40
codegen_flags: <defaults>
</compile_context>

<pallas_src>
import functools

import jax
import jax.numpy as jnp
from jax.experimental import pallas as pl
from jax.experimental.pallas import tpu as pltpu


def _round_up(x, m):
    return ((x + m - 1) // m) * m


def _fused_mlp_kernel(*refs, num_layers, tail_activation, compute_dtype):
    """Fully fused MLP tile: refs = (x, w0, b0, ..., w{L-1}, b{L-1}, out).

    x_ref : (TILE_N, C0)                 VMEM (true input width, no feature pad)
    wi_ref: (Ci_pad, C{i+1}_pad)         VMEM, compute_dtype, resident across grid
    bi_ref: (1, C{i+1}_pad)              VMEM, f32
    o_ref : (TILE_N, CL_pad)             VMEM (lane-dense: CL_pad % 128 == 0)

    Matmul operands in compute_dtype (bf16 by default) with f32 accumulation;
    bias add + ReLU in f32 (VPU filler under the MXU).  Intermediates are
    in-kernel values only -- no HBM round-trip between layers.
    """
    x_ref = refs[0]
    o_ref = refs[-1]
    h = x_ref[...].astype(compute_dtype)
    for i in range(num_layers):
        w_ref = refs[1 + 2 * i]
        b_ref = refs[2 + 2 * i]
        acc = jnp.dot(h, w_ref[...], preferred_element_type=jnp.float32)
        acc = acc + b_ref[...].astype(jnp.float32)   # single (1, C_out) broadcast
        is_last = i == num_layers - 1
        if (not is_last) or tail_activation:
            acc = jnp.maximum(acc, 0.0)
        h = acc if is_last else acc.astype(compute_dtype)
    o_ref[...] = h.astype(o_ref.dtype)


def prepare_limlp_params(params, compute_dtype=jnp.bfloat16):
    """Pad + cast parameters ONCE (hoisted out of the per-call path).

    - every layer's output dim is padded to a multiple of 128 (lane-dense),
      and the next layer's input dim is padded to match; the FIRST layer keeps
      the true input_channels so x never needs feature padding.
    - weights are cast to `compute_dtype` (bf16 -> native MXU operands, half
      the resident VMEM); biases stay f32 (added after f32 accumulation).
    Zero padding is semantically exact through bias, ReLU and the final slice.
    """
    dims = [params[0][0].shape[0]] + [w.shape[1] for (w, _) in params]
    dims_pad = [dims[0]] + [_round_up(d, 128) for d in dims[1:]]
    weights, biases = [], []
    for i, (w, b) in enumerate(params):
        cin, cout = w.shape
        w_p = jnp.zeros((dims_pad[i], dims_pad[i + 1]), compute_dtype)
        w_p = w_p.at[:cin, :cout].set(w.astype(compute_dtype))
        b_p = jnp.zeros((1, dims_pad[i + 1]), jnp.float32)
        b_p = b_p.at[0, :cout].set(b.astype(jnp.float32))
        weights.append(w_p)
        biases.append(b_p)
    return dict(weights=weights, biases=biases, dims=dims, dims_pad=dims_pad,
                compute_dtype=compute_dtype)


def limlp_forward(x, prepared, *, tail_activation=False, tile_n=None):
    """Forward pass of LIMLP: Linear [ReLU Dropout(0) Linear]* (+ optional tail ReLU).

    Dropout(p=0.0) is the identity, so it is omitted.
    # TODO(synk): dropout > 0 (training mode) not implemented; module default is 0.0.
    """
    n, c_in = x.shape
    weights, biases = prepared["weights"], prepared["biases"]
    dims, dims_pad = prepared["dims"], prepared["dims_pad"]
    compute_dtype = prepared["compute_dtype"]
    num_layers = len(weights)
    assert c_in == dims[0], "input width mismatch with prepared params"
    out_dtype = x.dtype
    c_out = dims[-1]

    # ---- generation-aware VMEM capacity --------------------------------------
    try:
        info = pltpu.get_tpu_info()
        vmem_cap = getattr(info, "vmem_capacity_bytes", None) or (64 << 20)
    except Exception:  # pragma: no cover - conservative fallback
        vmem_cap = 64 << 20

    # ---- row-tile selection ---------------------------------------------------
    # 128-MiB chips (v5e/v6e): 512-row tiles (~85% of HBM roofline in sweeps);
    # 64-MiB v7x: 256.  Always a multiple of 8.
    if tile_n is None:
        tile_n = 512 if vmem_cap >= (96 << 20) else 256
    tile_n = max(8, min(_round_up(tile_n, 8), _round_up(n, 8)))
    # Prefer >=2 grid steps so dimension_semantics=("parallel",) can shard the
    # N axis across both TensorCores on v7x.
    if n > 8 and _round_up(n, tile_n) // tile_n < 2:
        tile_n = max(8, _round_up(-(-n // 2), 8))
    n_pad = _round_up(n, tile_n)

    # Only the batch dim is ever padded; features stay at true c_in, so the
    # activations never take an 8x feature-padding round-trip through HBM.
    x_in = x if n_pad == n else jnp.pad(x, ((0, n_pad - n), (0, 0)))

    grid = (n_pad // tile_n,)
    flat_args = [x_in]
    for w_p, b_p in zip(weights, biases):
        flat_args += [w_p, b_p]

    itemsize_out = jnp.dtype(out_dtype).itemsize
    param_bytes = sum(w.size * w.dtype.itemsize + b.size * b.dtype.itemsize
                      for w, b in zip(weights, biases))
    flops = sum(2 * n_pad * dims_pad[i] * dims_pad[i + 1]
                for i in range(num_layers))
    bytes_accessed = (x_in.size * x_in.dtype.itemsize + param_bytes
                      + n_pad * dims_pad[-1] * itemsize_out)
    cost = pl.CostEstimate(flops=flops, transcendentals=0,
                           bytes_accessed=bytes_accessed)

    def make_call(single_buffer_params):
        const_idx = lambda i: (0, 0)
        in_specs = [pl.BlockSpec((tile_n, c_in), lambda i: (i, 0))]
        for w_p, b_p in zip(weights, biases):
            if single_buffer_params:
                # Constant-index resident operands: 1 buffer, not the default 2.
                in_specs.append(pl.BlockSpec(w_p.shape, const_idx,
                                             pipeline_mode=pl.Buffered(1)))
                in_specs.append(pl.BlockSpec(b_p.shape, const_idx,
                                             pipeline_mode=pl.Buffered(1)))
            else:
                in_specs.append(pl.BlockSpec(w_p.shape, const_idx))
                in_specs.append(pl.BlockSpec(b_p.shape, const_idx))
        out_spec = pl.BlockSpec((tile_n, dims_pad[-1]), lambda i: (i, 0))

        param_bufs = 1 if single_buffer_params else 2
        vmem_need = (
            2 * tile_n * c_in * x_in.dtype.itemsize          # x tiles (double-buffered)
            + 2 * tile_n * dims_pad[-1] * itemsize_out       # out tiles
            + param_bufs * param_bytes                       # resident weights/biases
            + 2 * tile_n * max(dims_pad) * 4                 # f32 intermediates slack
        )
        # TODO(synk): weight-streaming fallback (2-deep per-layer weight buffers)
        # for configs whose resident weights outgrow the per-core VMEM budget (v7x).
        vmem_limit = max(2 * vmem_need, 16 << 20)
        vmem_limit = min(vmem_limit, int(0.75 * vmem_cap))
        vmem_limit = min(max(vmem_limit, vmem_need), vmem_cap)

        return pl.pallas_call(
            functools.partial(_fused_mlp_kernel, num_layers=num_layers,
                              tail_activation=tail_activation,
                              compute_dtype=compute_dtype),
            out_shape=jax.ShapeDtypeStruct((n_pad, dims_pad[-1]), out_dtype),
            grid=grid,
            in_specs=in_specs,
            out_specs=out_spec,
            compiler_params=pltpu.CompilerParams(
                dimension_semantics=("parallel",),   # shards N tiles across v7x's 2 TCs
                vmem_limit_bytes=int(vmem_limit),
            ),
            cost_estimate=cost,
        )

    try:
        out_pad = make_call(True)(*flat_args)
    except Exception:
        # Fallback if this jax version rejects pipeline_mode=Buffered(1).
        out_pad = make_call(False)(*flat_args)

    return out_pad[:n, :c_out]


def init_limlp_params(key, input_channels, hidden_channels, output_channels,
                      num_layers, dtype=jnp.float32):
    """Deterministic init mirroring LIMLP.__init__ layer shapes.

    Returns list of (W, b) with W shaped (C_in, C_out) (transposed relative to
    PyTorch's (C_out, C_in) storage) so the kernel computes y = x @ W + b.
    """
    if num_layers == 1:
        shapes = [(input_channels, output_channels)]
    else:
        shapes = [(input_channels, hidden_channels)]
        shapes += [(hidden_channels, hidden_channels)] * (num_layers - 2)
        shapes += [(hidden_channels, output_channels)]

    params = []
    for (cin, cout) in shapes:
        key, kw, kb = jax.random.split(key, 3)
        bound = 1.0 / (cin ** 0.5)          # PyTorch-style uniform bound
        w = jax.random.uniform(kw, (cin, cout), dtype, -bound, bound)
        b = jax.random.uniform(kb, (cout,), dtype, -bound, bound)
        params.append((w, b))
    return params


def limlp_reference(x, params, *, tail_activation=False, compute_dtype=None):
    """Plain-JAX reference.  With compute_dtype=bf16 it emulates the kernel's
    bf16-operand / f32-accumulate matmuls for a tight numerical check."""
    n_layers = len(params)
    h = x
    for i, (w, b) in enumerate(params):
        if compute_dtype is not None:
            acc = jnp.dot(h.astype(compute_dtype), w.astype(compute_dtype),
                          preferred_element_type=jnp.float32) + b
        else:
            acc = h @ w + b
        if (i < n_layers - 1) or tail_activation:
            acc = jnp.maximum(acc, 0.0)
        h = acc
    return h


if __name__ == "__main__":
    # Module config: LIMLP(input_channels=16, hidden_channels=32,
    #                      output_channels=8, num_layers=3)
    input_channels, hidden_channels, output_channels, num_layers = 16, 32, 8, 3
    batch = 8

    key = jax.random.PRNGKey(0)
    key, kx = jax.random.split(key)
    x = jax.random.normal(kx, (batch, input_channels), jnp.float32)

    params = init_limlp_params(key, input_channels, hidden_channels,
                               output_channels, num_layers)

    # Pad/cast params ONCE (not per forward call).
    prepared = prepare_limlp_params(params, compute_dtype=jnp.bfloat16)

    out = limlp_forward(x, prepared)
    out = jax.block_until_ready(out)
    assert out.shape == (batch, output_channels)

    # Tight check against a reference that emulates the bf16-operand matmuls,
    # loose check against the pure-f32 module semantics.
    ref_bf16 = limlp_reference(x, params, compute_dtype=jnp.bfloat16)
    ref_f32 = limlp_reference(x, params)
    assert jnp.allclose(out, ref_bf16, atol=1e-4, rtol=1e-4)
    assert jnp.allclose(out, ref_f32, atol=3e-2, rtol=3e-2)

    print("KERNEL_OK")
</pallas_src>

<mosaic_0001>
module attributes {stable_mosaic.version = 11 : i64} {
  func.func @_fused_mlp_kernel(%arg0: i32, %arg1: memref<8x16xf32, #tpu.memory_space<vmem>>, %arg2: memref<16x128xbf16, #tpu.memory_space<vmem>>, %arg3: memref<1x128xf32, #tpu.memory_space<vmem>>, %arg4: memref<128x128xbf16, #tpu.memory_space<vmem>>, %arg5: memref<1x128xf32, #tpu.memory_space<vmem>>, %arg6: memref<128x128xbf16, #tpu.memory_space<vmem>>, %arg7: memref<1x128xf32, #tpu.memory_space<vmem>>, %arg8: memref<8x128xf32, #tpu.memory_space<vmem>>) attributes {dimension_semantics = [#tpu.dimension_semantics<parallel>], iteration_bounds = array<i64: 1>, scalar_prefetch = 0 : i64, scratch_operands = 0 : i64, tpu.core_type = #tpu.core_type<tc>, window_params = [{transform_indices = @transform_0, window_bounds = array<i64: 8, 16>}, {pipeline_mode = #tpu.pipeline_mode<synchronous>, transform_indices = @transform_1, window_bounds = array<i64: 16, 128>}, {pipeline_mode = #tpu.pipeline_mode<synchronous>, transform_indices = @transform_2, window_bounds = array<i64: 1, 128>}, {pipeline_mode = #tpu.pipeline_mode<synchronous>, transform_indices = @transform_3, window_bounds = array<i64: 128, 128>}, {pipeline_mode = #tpu.pipeline_mode<synchronous>, transform_indices = @transform_4, window_bounds = array<i64: 1, 128>}, {pipeline_mode = #tpu.pipeline_mode<synchronous>, transform_indices = @transform_5, window_bounds = array<i64: 128, 128>}, {pipeline_mode = #tpu.pipeline_mode<synchronous>, transform_indices = @transform_6, window_bounds = array<i64: 1, 128>}, {transform_indices = @transform_7, window_bounds = array<i64: 8, 128>}]} {
    %c0 = arith.constant 0 : index
    %c0_0 = arith.constant 0 : index
    %0 = vector.load %arg1[%c0, %c0_0] : memref<8x16xf32, #tpu.memory_space<vmem>>, vector<8x16xf32>
    %1 = arith.truncf %0 : vector<8x16xf32> to vector<8x16xbf16>
    %c0_1 = arith.constant 0 : index
    %c0_2 = arith.constant 0 : index
    %2 = vector.load %arg2[%c0_1, %c0_2] : memref<16x128xbf16, #tpu.memory_space<vmem>>, vector<16x128xbf16>
    %cst = arith.constant dense<0.000000e+00> : vector<8x128xf32>
    %3 = tpu.matmul %1, %2, %cst {dimension_numbers = #tpu.dot_dimension_numbers<[1], [0], [0], [1], [0, 0, 1, 1], [], []>} : vector<8x16xbf16>, vector<16x128xbf16>, vector<8x128xf32> -> vector<8x128xf32>
    %c0_3 = arith.constant 0 : index
    %c0_4 = arith.constant 0 : index
    %4 = vector.load %arg3[%c0_3, %c0_4] : memref<1x128xf32, #tpu.memory_space<vmem>>, vector<1x128xf32>
    %5 = vector.broadcast %4 : vector<1x128xf32> to vector<8x128xf32>
    %6 = arith.addf %3, %5 : vector<8x128xf32>
    %cst_5 = arith.constant 0.000000e+00 : f32
    %7 = vector.broadcast %cst_5 : f32 to vector<8x128xf32>
    %8 = arith.maximumf %6, %7 : vector<8x128xf32>
    %9 = arith.truncf %8 : vector<8x128xf32> to vector<8x128xbf16>
    %c0_6 = arith.constant 0 : index
    %c0_7 = arith.constant 0 : index
    %10 = vector.load %arg4[%c0_6, %c0_7] : memref<128x128xbf16, #tpu.memory_space<vmem>>, vector<128x128xbf16>
    %cst_8 = arith.constant dense<0.000000e+00> : vector<8x128xf32>
    %11 = tpu.matmul %9, %10, %cst_8 {dimension_numbers = #tpu.dot_dimension_numbers<[1], [0], [0], [1], [0, 0, 1, 1], [], []>} : vector<8x128xbf16>, vector<128x128xbf16>, vector<8x128xf32> -> vector<8x128xf32>
    %c0_9 = arith.constant 0 : index
    %c0_10 = arith.constant 0 : index
    %12 = vector.load %arg5[%c0_9, %c0_10] : memref<1x128xf32, #tpu.memory_space<vmem>>, vector<1x128xf32>
    %13 = vector.broadcast %12 : vector<1x128xf32> to vector<8x128xf32>
    %14 = arith.addf %11, %13 : vector<8x128xf32>
    %cst_11 = arith.constant 0.000000e+00 : f32
    %15 = vector.broadcast %cst_11 : f32 to vector<8x128xf32>
    %16 = arith.maximumf %14, %15 : vector<8x128xf32>
    %17 = arith.truncf %16 : vector<8x128xf32> to vector<8x128xbf16>
    %c0_12 = arith.constant 0 : index
    %c0_13 = arith.constant 0 : index
    %18 = vector.load %arg6[%c0_12, %c0_13] : memref<128x128xbf16, #tpu.memory_space<vmem>>, vector<128x128xbf16>
    %cst_14 = arith.constant dense<0.000000e+00> : vector<8x128xf32>
    %19 = tpu.matmul %17, %18, %cst_14 {dimension_numbers = #tpu.dot_dimension_numbers<[1], [0], [0], [1], [0, 0, 1, 1], [], []>} : vector<8x128xbf16>, vector<128x128xbf16>, vector<8x128xf32> -> vector<8x128xf32>
    %c0_15 = arith.constant 0 : index
    %c0_16 = arith.constant 0 : index
    %20 = vector.load %arg7[%c0_15, %c0_16] : memref<1x128xf32, #tpu.memory_space<vmem>>, vector<1x128xf32>
    %21 = vector.broadcast %20 : vector<1x128xf32> to vector<8x128xf32>
    %22 = arith.addf %19, %21 : vector<8x128xf32>
    %c0_17 = arith.constant 0 : index
    %c0_18 = arith.constant 0 : index
    %23 = vector.load %arg8[%c0_17, %c0_18] : memref<8x128xf32, #tpu.memory_space<vmem>>, vector<8x128xf32>
    tpu.vector_store %arg8[%c0_17, %c0_18], %22 {strides = array<i32>} : memref<8x128xf32, #tpu.memory_space<vmem>>, vector<8x128xf32>,
    return
  }
  func.func @transform_0(%arg0: i32) -> (i32, i32) {
    %c0_i32 = arith.constant 0 : i32
    %c0_i32_0 = arith.constant 0 : i32
    return %arg0, %c0_i32 : i32, i32
  }
  func.func @transform_1(%arg0: i32) -> (i32, i32) {
    %c0_i32 = arith.constant 0 : i32
    %c0_i32_0 = arith.constant 0 : i32
    %c0_i32_1 = arith.constant 0 : i32
    return %c0_i32, %c0_i32_0 : i32, i32
  }
  func.func @transform_2(%arg0: i32) -> (i32, i32) {
    %c0_i32 = arith.constant 0 : i32
    %c0_i32_0 = arith.constant 0 : i32
    %c0_i32_1 = arith.constant 0 : i32
    return %c0_i32, %c0_i32_0 : i32, i32
  }
  func.func @transform_3(%arg0: i32) -> (i32, i32) {
    %c0_i32 = arith.constant 0 : i32
    %c0_i32_0 = arith.constant 0 : i32
    %c0_i32_1 = arith.constant 0 : i32
    return %c0_i32, %c0_i32_0 : i32, i32
  }
  func.func @transform_4(%arg0: i32) -> (i32, i32) {
    %c0_i32 = arith.constant 0 : i32
    %c0_i32_0 = arith.constant 0 : i32
    %c0_i32_1 = arith.constant 0 : i32
    return %c0_i32, %c0_i32_0 : i32, i32
  }
  func.func @transform_5(%arg0: i32) -> (i32, i32) {
    %c0_i32 = arith.constant 0 : i32
    %c0_i32_0 = arith.constant 0 : i32
    %c0_i32_1 = arith.constant 0 : i32
    return %c0_i32, %c0_i32_0 : i32, i32
  }
  func.func @transform_6(%arg0: i32) -> (i32, i32) {
    %c0_i32 = arith.constant 0 : i32
    %c0_i32_0 = arith.constant 0 : i32
    %c0_i32_1 = arith.constant 0 : i32
    return %c0_i32, %c0_i32_0 : i32, i32
  }
  func.func @transform_7(%arg0: i32) -> (i32, i32) {
    %c0_i32 = arith.constant 0 : i32
    %c0_i32_0 = arith.constant 0 : i32
    return %arg0, %c0_i32 : i32, i32
  }
}

module attributes {stable_mosaic.version = 11 : i64} {
  func.func @_fused_mlp_kernel(%arg0: i32, %arg1: memref<8x16xf32, #tpu.memory_space<vmem>>, %arg2: memref<16x128xbf16, #tpu.memory_space<vmem>>, %arg3: memref<1x128xf32, #tpu.memory_space<vmem>>, %arg4: memref<128x128xbf16, #tpu.memory_space<vmem>>, %arg5: memref<1x128xf32, #tpu.memory_space<vmem>>, %arg6: memref<128x128xbf16, #tpu.memory_space<vmem>>, %arg7: memref<1x128xf32, #tpu.memory_space<vmem>>, %arg8: memref<8x128xf32, #tpu.memory_space<vmem>>) attributes {dimension_semantics = [#tpu.dimension_semantics<parallel>], iteration_bounds = array<i64: 1>, scalar_prefetch = 0 : i64, scratch_operands = 0 : i64, tpu.core_type = #tpu.core_type<tc>, window_params = [{transform_indices = @transform_0, window_bounds = array<i64: 8, 16>}, {pipeline_mode = #tpu.pipeline_mode<synchronous>, transform_indices = @transform_1, window_bounds = array<i64: 16, 128>}, {pipeline_mode = #tpu.pipeline_mode<synchronous>, transform_indices = @transform_2, window_bounds = array<i64: 1, 128>}, {pipeline_mode = #tpu.pipeline_mode<synchronous>, transform_indices = @transform_3, window_bounds = array<i64: 128, 128>}, {pipeline_mode = #tpu.pipeline_mode<synchronous>, transform_indices = @transform_4, window_bounds = array<i64: 1, 128>}, {pipeline_mode = #tpu.pipeline_mode<synchronous>, transform_indices = @transform_5, window_bounds = array<i64: 128, 128>}, {pipeline_mode = #tpu.pipeline_mode<synchronous>, transform_indices = @transform_6, window_bounds = array<i64: 1, 128>}, {transform_indices = @transform_7, window_bounds = array<i64: 8, 128>}]} {
    %c0 = arith.constant 0 : index
    %c0_0 = arith.constant 0 : index
    %0 = vector.load %arg1[%c0, %c0_0] : memref<8x16xf32, #tpu.memory_space<vmem>>, vector<8x16xf32>
    %1 = arith.truncf %0 : vector<8x16xf32> to vector<8x16xbf16>
    %c0_1 = arith.constant 0 : index
    %c0_2 = arith.constant 0 : index
    %2 = vector.load %arg2[%c0_1, %c0_2] : memref<16x128xbf16, #tpu.memory_space<vmem>>, vector<16x128xbf16>
    %cst = arith.constant dense<0.000000e+00> : vector<8x128xf32>
    %3 = tpu.matmul %1, %2, %cst {dimension_numbers = #tpu.dot_dimension_numbers<[1], [0], [0], [1], [0, 0, 1, 1], [], []>} : vector<8x16xbf16>, vector<16x128xbf16>, vector<8x128xf32> -> vector<8x128xf32>
    %c0_3 = arith.constant 0 : index
    %c0_4 = arith.constant 0 : index
    %4 = vector.load %arg3[%c0_3, %c0_4] : memref<1x128xf32, #tpu.memory_space<vmem>>, vector<1x128xf32>
    %5 = vector.broadcast %4 : vector<1x128xf32> to vector<8x128xf32>
    %6 = arith.addf %3, %5 : vector<8x128xf32>
    %cst_5 = arith.constant 0.000000e+00 : f32
    %7 = vector.broadcast %cst_5 : f32 to vector<8x128xf32>
    %8 = arith.maximumf %6, %7 : vector<8x128xf32>
    %9 = arith.truncf %8 : vector<8x128xf32> to vector<8x128xbf16>
    %c0_6 = arith.constant 0 : index
    %c0_7 = arith.constant 0 : index
    %10 = vector.load %arg4[%c0_6, %c0_7] : memref<128x128xbf16, #tpu.memory_space<vmem>>, vector<128x128xbf16>
    %cst_8 = arith.constant dense<0.000000e+00> : vector<8x128xf32>
    %11 = tpu.matmul %9, %10, %cst_8 {dimension_numbers = #tpu.dot_dimension_numbers<[1], [0], [0], [1], [0, 0, 1, 1], [], []>} : vector<8x128xbf16>, vector<128x128xbf16>, vector<8x128xf32> -> vector<8x128xf32>
    %c0_9 = arith.constant 0 : index
    %c0_10 = arith.constant 0 : index
    %12 = vector.load %arg5[%c0_9, %c0_10] : memref<1x128xf32, #tpu.memory_space<vmem>>, vector<1x128xf32>
    %13 = vector.broadcast %12 : vector<1x128xf32> to vector<8x128xf32>
    %14 = arith.addf %11, %13 : vector<8x128xf32>
    %cst_11 = arith.constant 0.000000e+00 : f32
    %15 = vector.broadcast %cst_11 : f32 to vector<8x128xf32>
    %16 = arith.maximumf %14, %15 : vector<8x128xf32>
    %17 = arith.truncf %16 : vector<8x128xf32> to vector<8x128xbf16>
    %c0_12 = arith.constant 0 : index
    %c0_13 = arith.constant 0 : index
    %18 = vector.load %arg6[%c0_12, %c0_13] : memref<128x128xbf16, #tpu.memory_space<vmem>>, vector<128x128xbf16>
    %cst_14 = arith.constant dense<0.000000e+00> : vector<8x128xf32>
    %19 = tpu.matmul %17, %18, %cst_14 {dimension_numbers = #tpu.dot_dimension_numbers<[1], [0], [0], [1], [0, 0, 1, 1], [], []>} : vector<8x128xbf16>, vector<128x128xbf16>, vector<8x128xf32> -> vector<8x128xf32>
    %c0_15 = arith.constant 0 : index
    %c0_16 = arith.constant 0 : index
    %20 = vector.load %arg7[%c0_15, %c0_16] : memref<1x128xf32, #tpu.memory_space<vmem>>, vector<1x128xf32>
    %21 = vector.broadcast %20 : vector<1x128xf32> to vector<8x128xf32>
    %22 = arith.addf %19, %21 : vector<8x128xf32>
    %c0_17 = arith.constant 0 : index
    %c0_18 = arith.constant 0 : index
    %23 = vector.load %arg8[%c0_17, %c0_18] : memref<8x128xf32, #tpu.memory_space<vmem>>, vector<8x128xf32>
    tpu.vector_store %arg8[%c0_17, %c0_18], %22 {strides = array<i32>} : memref<8x128xf32, #tpu.memory_space<vmem>>, vector<8x128xf32>,
    return
  }
  func.func @transform_0(%arg0: i32) -> (i32, i32) {
    %c0_i32 = arith.constant 0 : i32
    %c0_i32_0 = arith.constant 0 : i32
    return %arg0, %c0_i32 : i32, i32
  }
  func.func @transform_1(%arg0: i32) -> (i32, i32) {
    %c0_i32 = arith.constant 0 : i32
    %c0_i32_0 = arith.constant 0 : i32
    %c0_i32_1 = arith.constant 0 : i32
    return %c0_i32, %c0_i32_0 : i32, i32
  }
  func.func @transform_2(%arg0: i32) -> (i32, i32) {
    %c0_i32 = arith.constant 0 : i32
    %c0_i32_0 = arith.constant 0 : i32
    %c0_i32_1 = arith.constant 0 : i32
    return %c0_i32, %c0_i32_0 : i32, i32
  }
  func.func @transform_3(%arg0: i32) -> (i32, i32) {
    %c0_i32 = arith.constant 0 : i32
    %c0_i32_0 = arith.constant 0 : i32
    %c0_i32_1 = arith.constant 0 : i32
    return %c0_i32, %c0_i32_0 : i32, i32
  }
  func.func @transform_4(%arg0: i32) -> (i32, i32) {
    %c0_i32 = arith.constant 0 : i32
    %c0_i32_0 = arith.constant 0 : i32
    %c0_i32_1 = arith.constant 0 : i32
    return %c0_i32, %c0_i32_0 : i32, i32
  }
  func.func @transform_5(%arg0: i32) -> (i32, i32) {
    %c0_i32 = arith.constant 0 : i32
    %c0_i32_0 = arith.constant 0 : i32
    %c0_i32_1 = arith.constant 0 : i32
    return %c0_i32, %c0_i32_0 : i32, i32
  }
  func.func @transform_6(%arg0: i32) -> (i32, i32) {
    %c0_i32 = arith.constant 0 : i32
    %c0_i32_0 = arith.constant 0 : i32
    %c0_i32_1 = arith.constant 0 : i32
    return %c0_i32, %c0_i32_0 : i32, i32
  }
  func.func @transform_7(%arg0: i32) -> (i32, i32) {
    %c0_i32 = arith.constant 0 : i32
    %c0_i32_0 = arith.constant 0 : i32
    return %arg0, %c0_i32 : i32, i32
  }
}

</mosaic_0001>

<bundles_post_ra>
// kernel: tpu_custom_call.1
= control target key start
LH: loop header
LB: loop body
LE: loop exit
PB: predicated region body
PF: predicated region fallthrough
CT: control target
= control target key end

     0   :  { %12 = vsyncpa [#allocation3], 0  ;;  %s601_s0 = inlined_call_operand.hbm [shape: f32[8,16], index: 0, kind: input, shape index: {}]   ;;  %s602_s1 = inlined_call_operand.hbm [shape: bf16[16,128], index: 1, kind: input, shape index: {}]   ;;  %s603_s2 = inlined_call_operand.vmem [shape: f32[1,128], index: 2, kind: input, shape index: {}]   ;;  %s604_s3 = inlined_call_operand.hbm [shape: bf16[128,128], index: 3, kind: input, shape index: {}]   ;;  %s605_s4 = inlined_call_operand.vmem [shape: f32[1,128], index: 4, kind: input, shape index: {}]   ;;  %s606_s5 = inlined_call_operand.hbm [shape: bf16[128,128], index: 5, kind: input, shape index: {}]   ;;  %s607_s6 = inlined_call_operand.vmem [shape: f32[1,128], index: 6, kind: input, shape index: {}]   ;;  %s608_s7 = inlined_call_operand.hbm [shape: f32[8,128], index: 7, kind: output, shape index: {}]  }
   0x1   :  { %13 = vsyncpa [#allocation6], 0 }
   0x2   :  { %14 = vsyncpa [#allocation9], 0  ;;  %s31_s26 = sshll.u32 %s602_s1, 4  ;;  %s32_s26 = int_to_ptr.hbm [resolvable:$true] %s31_s26 }
   0x3   :  { %15 = vsyncpa [#allocation4], 0  ;;  %s530_s27 = smov [#allocation5]   ;;  %s21_s8 = sshll.u32 %s601_s0, 4  ;;  %s22_s8 = int_to_ptr.hbm [resolvable:$true] %s21_s8 }
   0x4   :  { %s33_s28 = sshll.u32 %s530_s27, 4  ;;  %s531_s9 = smov 64   ;;  %s34_s28 = int_to_ptr.vmem [resolvable:$true] %s33_s28 }
   0x5   :  { %s532_s10 = smov 4   ;;  %s533_s11 = smov [#allocation2]  }
   0x6   :  { %39 = dma.hbm_to_vmem [thread:$0]  %s32_s26, 128, %s34_s28, [#allocation6], %s531_s9, %s531_s9, %s532_s10  }
   0x7   :  { %s23_s12 = sshll.u32 %s533_s11, 4  ;;  %s46_s15 = sshll.u32 %s604_s3, 4  ;;  %s24_s12 = int_to_ptr.vmem [resolvable:$true] %s23_s12  ;;  %s47_s15 = int_to_ptr.hbm [resolvable:$true] %s46_s15 }
   0x8   :  { %26 = dma.hbm_to_vmem [thread:$0]  %s22_s8, 128, %s24_s12, [#allocation3]  }
   0x9   :  { %s61_s17 = sshll.u32 %s606_s5, 4  ;;  %s534_s18 = smov [#allocation7]   ;;  %s62_s17 = int_to_ptr.hbm [resolvable:$true] %s61_s17 }
   0xa   :  { %s48_s19 = sshll.u32 %s534_s18, 4  ;;  %s535_s0 = smov [#allocation8]   ;;  %s49_s19 = int_to_ptr.vmem [resolvable:$true] %s48_s19 }
   0xb   :  { %54 = dma.hbm_to_vmem [thread:$0]  %s47_s15, 1024, %s49_s19, [#allocation6], %s531_s9, %s531_s9, %s532_s10  }
   0xc   :  { %s63_s20 = sshll.u32 %s535_s0, 4  ;;  %s64_s20 = int_to_ptr.vmem [resolvable:$true] %s63_s20 }
   0xd   :  { %69 = dma.hbm_to_vmem [thread:$0]  %s62_s17, 1024, %s64_s20, [#allocation9], %s531_s9, %s531_s9, %s532_s10  }
   0xe   :  { %522 = dma.done.wait [#allocation3], 128  }
   0xf   :  { %523 = vsyncadd [#allocation3], 4294967168 }
  0x10   :  { %524 = dma.done.wait [#allocation6], 1152  }
  0x11   :  { %525 = vsyncadd [#allocation6], 4294966144 }
  0x12   :  { %526 = dma.done.wait [#allocation9], 1024  }
  0x13   :  { %527 = vsyncadd [#allocation9], 4294966272  ;;  %v375_v0 = vld [vmem:[#allocation5] sm:$0xff]  ;;  %v89_v1 = vld [vmem:[#allocation2] sm:$0xff]  ;;  %vm103_vm0 = vcmask 130048   ;;  %s536_s24 = smov [#allocation10]  }
  0x14   :  { %v383_v2 = vld [vmem:[#allocation7 + $0x38] sm:$0xff]  ;;  %v90_v3 = vpack.c.bf16 %v89_v1, %v89_v1  ;;  %114 = vmatpush.bf16.msra.mxu0 %v375_v0  ;;  %v382_v4 = vld [vmem:[#allocation7 + $0x30] sm:$0xff]  ;;  %v381_v5 = vld [vmem:[#allocation7 + $0x28] sm:$0xff]  ;;  %s292_s25 = sshll.u32 %s536_s24, 4  ;;  %s294_s28 = sshll.u32 %s608_s7, 4  ;;  %s293_s25 = int_to_ptr.vmem [resolvable:$true] %s292_s25  ;;  %s295_s28 = int_to_ptr.hbm [resolvable:$true] %s294_s28 }
  0x15   :  { %190 = vmatpush.bf16.msra.mxu1 %v383_v2  ;;  %v380_v6 = vld [vmem:[#allocation7 + $0x20] sm:$0xff]  ;;  %v379_v7 = vld [vmem:[#allocation7 + $0x18] sm:$0xff]  ;;  %v378_v8 = vld [vmem:[#allocation7 + $0x10] sm:$0xff] }
  0x16   :  { %v377_v9 = vld [vmem:[#allocation7 + $0x8] sm:$0xff]  ;;  %v376_v10 = vld [vmem:[#allocation7] sm:$0xff]  ;;  %v391_v11 = vld [vmem:[#allocation8 + $0x38] sm:$0xff] }
  0x17   :  { %310 = vmatmul.msk.bf16.vlgmr.msra.gmra.mxu0 %vm103_vm0, %v90_v3  ;;  %273 = vmatpush.bf16.msra.mxu2 %v391_v11  ;;  %v390_v12 = vld [vmem:[#allocation8 + $0x30] sm:$0xff]  ;;  %v389_v13 = vld [vmem:[#allocation8 + $0x28] sm:$0xff]  ;;  %v388_v14 = vld [vmem:[#allocation8 + $0x20] sm:$0xff] }
  0x18   :  { %v387_v15 = vld [vmem:[#allocation8 + $0x18] sm:$0xff]  ;;  %v386_v16 = vld [vmem:[#allocation8 + $0x10] sm:$0xff]  ;;  %v385_v23 = vld [vmem:[#allocation8 + $0x8] sm:$0xff] }
  0x19   :  { %191 = vmatpush.bf16.msra.mxu1 %v382_v4  ;;  %v399_v17 = vld [vmem:[%s603_s2] ss:$0 sm:$0xff]  ;;  %v384_v24 = vld [vmem:[#allocation8] sm:$0xff] }
  0x1a   :  { %v400_v25 = vld [vmem:[%s605_s4] ss:$0 sm:$0xff] }
  0x1b   :  { %274 = vmatpush.bf16.msra.mxu2 %v390_v12  ;;  %v401_v31 = vld [vmem:[%s607_s6] ss:$0 sm:$0xff] }
  0x1d   :  { %192 = vmatpush.bf16.msra.mxu1 %v381_v5 }
  0x1f   :  { %275 = vmatpush.bf16.msra.mxu2 %v389_v13 }
  0x21   :  { %193 = vmatpush.bf16.msra.mxu1 %v380_v6 }
  0x23   :  { %276 = vmatpush.bf16.msra.mxu2 %v388_v14 }
  0x25   :  { %194 = vmatpush.bf16.msra.mxu1 %v379_v7 }
  0x27   :  { %277 = vmatpush.bf16.msra.mxu2 %v387_v15 }
  0x29   :  { %195 = vmatpush.bf16.msra.mxu1 %v378_v8 }
  0x2b   :  { %278 = vmatpush.bf16.msra.mxu2 %v386_v16 }
  0x2d   :  { %196 = vmatpush.bf16.msra.mxu1 %v377_v9 }
  0x2f   :  { %279 = vmatpush.bf16.msra.mxu2 %v385_v23 }
  0x31   :  { %197 = vmatpush.bf16.msra.mxu1 %v376_v10 }
  0x33   :  { %280 = vmatpush.bf16.msra.mxu2 %v384_v24 }
  0x94   :  { %v116_v18 = vpop.f32.mrf.mxu0 }
  0x95   :  { %v117_v19 = vadd.f32 %v399_v17, %v116_v18 }
  0x97   :  { %v120_v20 = vmax.f32 %v117_v19, 0.0 }
  0x99   :  { %v121_v21 = vpack.c.bf16 %v120_v20, %v120_v20 }
  0x9b   :  { %198 = vmatmul.bf16.vlgmr.msra.gmra.mxu1 %v121_v21 }
  0x9c   :  { %v118_v22 = vpop.f32.mrf.mxu0 }
 0x118   :  { %v199_v26 = vpop.f32.mrf.mxu1 }
 0x119   :  { %v200_v27 = vadd.f32 %v400_v25, %v199_v26 }
 0x11b   :  { %v203_v28 = vmax.f32 %v200_v27, 0.0 }
 0x11d   :  { %v204_v29 = vpack.c.bf16 %v203_v28, %v203_v28 }
 0x11f   :  { %281 = vmatmul.bf16.vlgmr.msra.gmra.mxu2 %v204_v29 }
 0x120   :  { %v201_v30 = vpop.f32.mrf.mxu1 }
 0x1a2   :  { %v282_v32 = vpop.f32.mrf.mxu2 }
 0x1a3   :  { %v283_v33 = vadd.f32 %v401_v31, %v282_v32 }
 0x1a5   :  { %286 = vst [vmem:[#allocation10] sm:$0xff] %v283_v33 }
 0x1a6   :  { %297 = dma.vmem_to_hbm [thread:$0]  %s293_s25, 128, %s295_s28, [#allocation4]  }
 0x1aa   :  { %v284_v34 = vpop.f32.mrf.mxu2 }
 0x1ab   :  { %528 = dma.done.wait [#allocation4], 128  }
 0x1ac   :  { %529 = vsyncadd [#allocation4], 4294967168 }
 0x1ad   :  { %302 = vsyncpa [#allocation3], 1 }
 0x1ae   :  { %303 = vsyncpa [#allocation6], 1 }
 0x1af   :  { %304 = vsyncpa [#allocation9], 1 }
 0x1b0   :  { %305 = vsyncpa [#allocation4], 1 }

// kernel: tpu_custom_call.1
= control target key start
LH: loop header
LB: loop body
LE: loop exit
PB: predicated region body
PF: predicated region fallthrough
CT: control target
= control target key end

     0   :  { %12 = vsyncpa [#allocation3], 0  ;;  %s601_s0 = inlined_call_operand.hbm [shape: f32[8,16], index: 0, kind: input, shape index: {}]   ;;  %s602_s1 = inlined_call_operand.hbm [shape: bf16[16,128], index: 1, kind: input, shape index: {}]   ;;  %s603_s2 = inlined_call_operand.vmem [shape: f32[1,128], index: 2, kind: input, shape index: {}]   ;;  %s604_s3 = inlined_call_operand.hbm [shape: bf16[128,128], index: 3, kind: input, shape index: {}]   ;;  %s605_s4 = inlined_call_operand.vmem [shape: f32[1,128], index: 4, kind: input, shape index: {}]   ;;  %s606_s5 = inlined_call_operand.hbm [shape: bf16[128,128], index: 5, kind: input, shape index: {}]   ;;  %s607_s6 = inlined_call_operand.vmem [shape: f32[1,128], index: 6, kind: input, shape index: {}]   ;;  %s608_s7 = inlined_call_operand.hbm [shape: f32[8,128], index: 7, kind: output, shape index: {}]  }
   0x1   :  { %13 = vsyncpa [#allocation6], 0 }
   0x2   :  { %14 = vsyncpa [#allocation9], 0  ;;  %s31_s26 = sshll.u32 %s602_s1, 4  ;;  %s32_s26 = int_to_ptr.hbm [resolvable:$true] %s31_s26 }
   0x3   :  { %15 = vsyncpa [#allocation4], 0  ;;  %s530_s27 = smov [#allocation5]   ;;  %s21_s8 = sshll.u32 %s601_s0, 4  ;;  %s22_s8 = int_to_ptr.hbm [resolvable:$true] %s21_s8 }
   0x4   :  { %s33_s28 = sshll.u32 %s530_s27, 4  ;;  %s531_s9 = smov 64   ;;  %s34_s28 = int_to_ptr.vmem [resolvable:$true] %s33_s28 }
   0x5   :  { %s532_s10 = smov 4   ;;  %s533_s11 = smov [#allocation2]  }
   0x6   :  { %39 = dma.hbm_to_vmem [thread:$0]  %s32_s26, 128, %s34_s28, [#allocation6], %s531_s9, %s531_s9, %s532_s10  }
   0x7   :  { %s23_s12 = sshll.u32 %s533_s11, 4  ;;  %s46_s15 = sshll.u32 %s604_s3, 4  ;;  %s24_s12 = int_to_ptr.vmem [resolvable:$true] %s23_s12  ;;  %s47_s15 = int_to_ptr.hbm [resolvable:$true] %s46_s15 }
   0x8   :  { %26 = dma.hbm_to_vmem [thread:$0]  %s22_s8, 128, %s24_s12, [#allocation3]  }
   0x9   :  { %s61_s17 = sshll.u32 %s606_s5, 4  ;;  %s534_s18 = smov [#allocation7]   ;;  %s62_s17 = int_to_ptr.hbm [resolvable:$true] %s61_s17 }
   0xa   :  { %s48_s19 = sshll.u32 %s534_s18, 4  ;;  %s535_s0 = smov [#allocation8]   ;;  %s49_s19 = int_to_ptr.vmem [resolvable:$true] %s48_s19 }
   0xb   :  { %54 = dma.hbm_to_vmem [thread:$0]  %s47_s15, 1024, %s49_s19, [#allocation6], %s531_s9, %s531_s9, %s532_s10  }
   0xc   :  { %s63_s20 = sshll.u32 %s535_s0, 4  ;;  %s64_s20 = int_to_ptr.vmem [resolvable:$true] %s63_s20 }
   0xd   :  { %69 = dma.hbm_to_vmem [thread:$0]  %s62_s17, 1024, %s64_s20, [#allocation9], %s531_s9, %s531_s9, %s532_s10  }
   0xe   :  { %522 = dma.done.wait [#allocation3], 128  }
   0xf   :  { %523 = vsyncadd [#allocation3], 4294967168 }
  0x10   :  { %524 = dma.done.wait [#allocation6], 1152  }
  0x11   :  { %525 = vsyncadd [#allocation6], 4294966144 }
  0x12   :  { %526 = dma.done.wait [#allocation9], 1024  }
  0x13   :  { %527 = vsyncadd [#allocation9], 4294966272  ;;  %v375_v0 = vld [vmem:[#allocation5] sm:$0xff]  ;;  %v89_v1 = vld [vmem:[#allocation2] sm:$0xff]  ;;  %vm103_vm0 = vcmask 130048   ;;  %s536_s24 = smov [#allocation10]  }
  0x14   :  { %v383_v2 = vld [vmem:[#allocation7 + $0x38] sm:$0xff]  ;;  %v90_v3 = vpack.c.bf16 %v89_v1, %v89_v1  ;;  %114 = vmatpush.bf16.msra.mxu0 %v375_v0  ;;  %v382_v4 = vld [vmem:[#allocation7 + $0x30] sm:$0xff]  ;;  %v381_v5 = vld [vmem:[#allocation7 + $0x28] sm:$0xff]  ;;  %s292_s25 = sshll.u32 %s536_s24, 4  ;;  %s294_s28 = sshll.u32 %s608_s7, 4  ;;  %s293_s25 = int_to_ptr.vmem [resolvable:$true] %s292_s25  ;;  %s295_s28 = int_to_ptr.hbm [resolvable:$true] %s294_s28 }
  0x15   :  { %190 = vmatpush.bf16.msra.mxu1 %v383_v2  ;;  %v380_v6 = vld [vmem:[#allocation7 + $0x20] sm:$0xff]  ;;  %v379_v7 = vld [vmem:[#allocation7 + $0x18] sm:$0xff]  ;;  %v378_v8 = vld [vmem:[#allocation7 + $0x10] sm:$0xff] }
  0x16   :  { %v377_v9 = vld [vmem:[#allocation7 + $0x8] sm:$0xff]  ;;  %v376_v10 = vld [vmem:[#allocation7] sm:$0xff]  ;;  %v391_v11 = vld [vmem:[#allocation8 + $0x38] sm:$0xff] }
  0x17   :  { %310 = vmatmul.msk.bf16.vlgmr.msra.gmra.mxu0 %vm103_vm0, %v90_v3  ;;  %273 = vmatpush.bf16.msra.mxu2 %v391_v11  ;;  %v390_v12 = vld [vmem:[#allocation8 + $0x30] sm:$0xff]  ;;  %v389_v13 = vld [vmem:[#allocation8 + $0x28] sm:$0xff]  ;;  %v388_v14 = vld [vmem:[#allocation8 + $0x20] sm:$0xff] }
  0x18   :  { %v387_v15 = vld [vmem:[#allocation8 + $0x18] sm:$0xff]  ;;  %v386_v16 = vld [vmem:[#allocation8 + $0x10] sm:$0xff]  ;;  %v385_v23 = vld [vmem:[#allocation8 + $0x8] sm:$0xff] }
  0x19   :  { %191 = vmatpush.bf16.msra.mxu1 %v382_v4  ;;  %v399_v17 = vld [vmem:[%s603_s2] ss:$0 sm:$0xff]  ;;  %v384_v24 = vld [vmem:[#allocation8] sm:$0xff] }
  0x1a   :  { %v400_v25 = vld [vmem:[%s605_s4] ss:$0 sm:$0xff] }
  0x1b   :  { %274 = vmatpush.bf16.msra.mxu2 %v390_v12  ;;  %v401_v31 = vld [vmem:[%s607_s6] ss:$0 sm:$0xff] }
  0x1d   :  { %192 = vmatpush.bf16.msra.mxu1 %v381_v5 }
  0x1f   :  { %275 = vmatpush.bf16.msra.mxu2 %v389_v13 }
  0x21   :  { %193 = vmatpush.bf16.msra.mxu1 %v380_v6 }
  0x23   :  { %276 = vmatpush.bf16.msra.mxu2 %v388_v14 }
  0x25   :  { %194 = vmatpush.bf16.msra.mxu1 %v379_v7 }
  0x27   :  { %277 = vmatpush.bf16.msra.mxu2 %v387_v15 }
  0x29   :  { %195 = vmatpush.bf16.msra.mxu1 %v378_v8 }
  0x2b   :  { %278 = vmatpush.bf16.msra.mxu2 %v386_v16 }
  0x2d   :  { %196 = vmatpush.bf16.msra.mxu1 %v377_v9 }
  0x2f   :  { %279 = vmatpush.bf16.msra.mxu2 %v385_v23 }
  0x31   :  { %197 = vmatpush.bf16.msra.mxu1 %v376_v10 }
  0x33   :  { %280 = vmatpush.bf16.msra.mxu2 %v384_v24 }
  0x94   :  { %v116_v18 = vpop.f32.mrf.mxu0 }
  0x95   :  { %v117_v19 = vadd.f32 %v399_v17, %v116_v18 }
  0x97   :  { %v120_v20 = vmax.f32 %v117_v19, 0.0 }
  0x99   :  { %v121_v21 = vpack.c.bf16 %v120_v20, %v120_v20 }
  0x9b   :  { %198 = vmatmul.bf16.vlgmr.msra.gmra.mxu1 %v121_v21 }
  0x9c   :  { %v118_v22 = vpop.f32.mrf.mxu0 }
 0x118   :  { %v199_v26 = vpop.f32.mrf.mxu1 }
 0x119   :  { %v200_v27 = vadd.f32 %v400_v25, %v199_v26 }
 0x11b   :  { %v203_v28 = vmax.f32 %v200_v27, 0.0 }
 0x11d   :  { %v204_v29 = vpack.c.bf16 %v203_v28, %v203_v28 }
 0x11f   :  { %281 = vmatmul.bf16.vlgmr.msra.gmra.mxu2 %v204_v29 }
 0x120   :  { %v201_v30 = vpop.f32.mrf.mxu1 }
 0x1a2   :  { %v282_v32 = vpop.f32.mrf.mxu2 }
 0x1a3   :  { %v283_v33 = vadd.f32 %v401_v31, %v282_v32 }
 0x1a5   :  { %286 = vst [vmem:[#allocation10] sm:$0xff] %v283_v33 }
 0x1a6   :  { %297 = dma.vmem_to_hbm [thread:$0]  %s293_s25, 128, %s295_s28, [#allocation4]  }
 0x1aa   :  { %v284_v34 = vpop.f32.mrf.mxu2 }
 0x1ab   :  { %528 = dma.done.wait [#allocation4], 128  }
 0x1ac   :  { %529 = vsyncadd [#allocation4], 4294967168 }
 0x1ad   :  { %302 = vsyncpa [#allocation3], 1 }
 0x1ae   :  { %303 = vsyncpa [#allocation6], 1 }
 0x1af   :  { %304 = vsyncpa [#allocation9], 1 }
 0x1b0   :  { %305 = vsyncpa [#allocation4], 1 }

</bundles_post_ra>
